<compile_context>
chip_gen: v7x
topology: tpu7x:2x2x1
jax: 0.10.0
libtpu: 0.0.40
codegen_flags: <defaults>
</compile_context>

<pallas_src>
import functools
import math

import jax
import jax.numpy as jnp
from jax.experimental import pallas as pl
from jax.experimental.pallas import tpu as pltpu


# ----------------------------------------------------------------------------
# Parameter setup (matches PositionalEncoding._get_positional_encoding)
# ----------------------------------------------------------------------------
def make_positional_encoding(max_seq_len: int, d_model: int) -> jnp.ndarray:
    position = jnp.arange(max_seq_len, dtype=jnp.float32)[:, None]          # (S, 1)
    div_term = jnp.exp(
        jnp.arange(0, d_model, 2, dtype=jnp.float32) * (-math.log(10000.0) / d_model)
    )                                                                        # (D/2,)
    pe = jnp.zeros((max_seq_len, d_model), dtype=jnp.float32)
    pe = pe.at[:, 0::2].set(jnp.sin(position * div_term))
    pe = pe.at[:, 1::2].set(jnp.cos(position * div_term))
    return pe[None]                                                          # (1, S, D)


# ----------------------------------------------------------------------------
# Pallas kernel: add PE + inverted dropout on one (1, TR, L) tile
# ----------------------------------------------------------------------------
def _pe_add_dropout_kernel(seed_ref, x_ref, pe_ref, o_ref, *,
                           dropout_p: float, total_rows: int):
    y = x_ref[...] + pe_ref[...]                       # (1, TR, L) f32

    if dropout_p > 0.0:
        _, tr, lane = x_ref.shape
        b = pl.program_id(0)
        r = pl.program_id(1)

        # Global flat element index of every element in this tile (int32 math,
        # then reinterpret as uint32 for hashing).
        row = jax.lax.broadcasted_iota(jnp.int32, y.shape, 1)
        col = jax.lax.broadcasted_iota(jnp.int32, y.shape, 2)
        flat = ((b * total_rows + r * tr + row) * lane + col).astype(jnp.uint32)

        # lowbias32 counter hash, mixed with the seed.
        h = flat ^ seed_ref[0].astype(jnp.uint32)
        h = h ^ (h >> 16)
        h = h * jnp.uint32(0x7FEB352D)
        h = h ^ (h >> 15)
        h = h * jnp.uint32(0x846CA68B)
        h = h ^ (h >> 16)

        # Exact Bernoulli(1-p) keep via integer threshold compare.
        thr = min(int(round(dropout_p * 4294967296.0)), 4294967295)
        keep = h >= jnp.uint32(thr)
        scale = jnp.float32(1.0 / (1.0 - dropout_p))
        y = jnp.where(keep, y * scale, jnp.float32(0.0))

    o_ref[...] = y.astype(o_ref.dtype)


def _choose_row_tile(rows: int, lane: int, itemsize: int,
                     target_bytes: int = 2 << 20) -> int:
    """Pick a row-tile (multiple of 8, ~target_bytes, dividing `rows`)."""
    if rows <= 8:
        return rows
    tr = min(rows, max(8, target_bytes // (itemsize * lane)))
    tr -= tr % 8
    while tr > 8 and rows % tr != 0:
        tr -= 8
    if tr <= 0 or rows % tr != 0:
        tr = rows
    return tr


# ----------------------------------------------------------------------------
# Wrapper (= PositionalEncoding.forward)
# ----------------------------------------------------------------------------
def positional_encoding_forward(
    x: jnp.ndarray,            # (B, S, D) float32
    pe: jnp.ndarray,           # (1, max_seq_len, D) float32
    *,
    dropout_p: float,
    seed: int,
    past_length: int | None = None,
) -> jnp.ndarray:
    B, S, D = x.shape
    start = 0 if past_length is None else past_length - 1
    pe_win = jax.lax.dynamic_slice(pe, (0, start, 0), (1, S, D))             # (1, S, D)

    # Lane-dense view: fold (S, D) into rows of 128 lanes when possible so
    # stores are full-width vst instead of masked partial stores.
    lane = 128 if (S * D) % 128 == 0 else D
    rows = (S * D) // lane
    x2 = x.reshape(B, rows, lane)
    pe2 = pe_win.reshape(1, rows, lane)

    itemsize = jnp.dtype(x.dtype).itemsize
    tr = _choose_row_tile(rows, lane, itemsize)
    grid = (B, rows // tr)

    seed_arr = jnp.asarray([seed], dtype=jnp.int32)
    kernel = functools.partial(
        _pe_add_dropout_kernel, dropout_p=float(dropout_p), total_rows=rows
    )

    out2 = pl.pallas_call(
        kernel,
        out_shape=jax.ShapeDtypeStruct((B, rows, lane), x.dtype),
        grid_spec=pltpu.PrefetchScalarGridSpec(
            num_scalar_prefetch=1,                       # seed -> SMEM
            grid=grid,
            in_specs=[
                pl.BlockSpec((1, tr, lane), lambda b, r, seed: (b, r, 0)),   # x tile
                pl.BlockSpec((1, tr, lane), lambda b, r, seed: (0, r, 0)),   # pe tile
            ],
            out_specs=pl.BlockSpec((1, tr, lane), lambda b, r, seed: (b, r, 0)),
        ),
        compiler_params=pltpu.CompilerParams(
            dimension_semantics=("parallel", "parallel")),
    )(seed_arr, x2, pe2)

    return out2.reshape(B, S, D)


# ----------------------------------------------------------------------------
# Demo / smoke test
# ----------------------------------------------------------------------------
if __name__ == "__main__":
    MAX_SEQ_LEN, D_MODEL, DROPOUT = 16, 32, 0.1
    B, S = 2, 8

    key = jax.random.PRNGKey(0)
    x = jax.random.normal(key, (B, S, D_MODEL), dtype=jnp.float32)
    pe = make_positional_encoding(MAX_SEQ_LEN, D_MODEL)

    # 1) Training-mode forward (dropout active) with the past_length branch.
    y_train = positional_encoding_forward(
        x, pe, dropout_p=DROPOUT, seed=42, past_length=3
    )
    jax.block_until_ready(y_train)
    assert y_train.shape == (B, S, D_MODEL)

    # Kept elements must equal (x + pe_window) / (1 - p); dropped are exactly 0.
    pe_win = jax.lax.dynamic_slice(pe, (0, 2, 0), (1, S, D_MODEL))
    expected = (x + pe_win) * jnp.float32(1.0 / (1.0 - DROPOUT))
    kept = y_train != 0.0
    assert jnp.allclose(
        jnp.where(kept, y_train, 0.0), jnp.where(kept, expected, 0.0), atol=1e-5
    ), "dropout-kept values mismatch"

    # 2) Deterministic check (p=0.0 path == pure add) against a JAX reference.
    y_eval = positional_encoding_forward(x, pe, dropout_p=0.0, seed=0)
    jax.block_until_ready(y_eval)
    ref = x + pe[:, :S, :]
    assert jnp.allclose(y_eval, ref, atol=1e-6), "mismatch vs reference add"

    print("KERNEL_OK")
</pallas_src>

<mosaic_0001>
module attributes {stable_mosaic.version = 11 : i64} {
  func.func @_pe_add_dropout_kernel(%arg0: i32, %arg1: i32, %arg2: memref<1xi32, #tpu.memory_space<smem>>, %arg3: memref<1x2x128xf32, #tpu.memory_space<vmem>>, %arg4: memref<1x2x128xf32, #tpu.memory_space<vmem>>, %arg5: memref<1x2x128xf32, #tpu.memory_space<vmem>>) attributes {dimension_semantics = [#tpu.dimension_semantics<parallel>, #tpu.dimension_semantics<parallel>], iteration_bounds = array<i64: 2, 1>, scalar_prefetch = 1 : i64, scratch_operands = 0 : i64, tpu.core_type = #tpu.core_type<tc>, window_params = [{transform_indices = @transform_0, window_bounds = array<i64: 1, 2, 128>}, {transform_indices = @transform_1, window_bounds = array<i64: 1, 2, 128>}, {transform_indices = @transform_2, window_bounds = array<i64: 1, 2, 128>}]} {
    %c0 = arith.constant 0 : index
    %c0_0 = arith.constant 0 : index
    %c0_1 = arith.constant 0 : index
    %0 = vector.load %arg3[%c0, %c0_0, %c0_1] : memref<1x2x128xf32, #tpu.memory_space<vmem>>, vector<1x2x128xf32>
    %c0_2 = arith.constant 0 : index
    %c0_3 = arith.constant 0 : index
    %c0_4 = arith.constant 0 : index
    %1 = vector.load %arg4[%c0_2, %c0_3, %c0_4] : memref<1x2x128xf32, #tpu.memory_space<vmem>>, vector<1x2x128xf32>
    %2 = arith.addf %0, %1 : vector<1x2x128xf32>
    %3 = tpu.iota {dimensions = array<i32: 1>} : vector<1x2x128xi32>
    %4 = tpu.iota {dimensions = array<i32: 2>} : vector<1x2x128xi32>
    %c2_i32 = arith.constant 2 : i32
    %5 = arith.muli %arg0, %c2_i32 : i32
    %c2_i32_5 = arith.constant 2 : i32
    %6 = arith.muli %arg1, %c2_i32_5 : i32
    %7 = arith.addi %5, %6 : i32
    %8 = vector.broadcast %7 : i32 to vector<1x2x128xi32>
    %9 = arith.addi %8, %3 : vector<1x2x128xi32>
    %c128_i32 = arith.constant 128 : i32
    %10 = vector.broadcast %c128_i32 : i32 to vector<1x2x128xi32>
    %11 = arith.muli %9, %10 : vector<1x2x128xi32>
    %12 = arith.addi %11, %4 : vector<1x2x128xi32>
    %c0_6 = arith.constant 0 : index
    %13 = memref.load %arg2[%c0_6] : memref<1xi32, #tpu.memory_space<smem>>
    %14 = vector.broadcast %13 : i32 to vector<1x2x128xi32>
    %15 = arith.xori %12, %14 : vector<1x2x128xi32>
    %c16_i32 = arith.constant 16 : i32
    %16 = vector.broadcast %c16_i32 : i32 to vector<1x2x128xi32>
    %17 = arith.shrui %15, %16 : vector<1x2x128xi32>
    %18 = arith.xori %15, %17 : vector<1x2x128xi32>
    %c2146121005_i32 = arith.constant 2146121005 : i32
    %19 = vector.broadcast %c2146121005_i32 : i32 to vector<1x2x128xi32>
    %20 = arith.muli %18, %19 : vector<1x2x128xi32>
    %c15_i32 = arith.constant 15 : i32
    %21 = vector.broadcast %c15_i32 : i32 to vector<1x2x128xi32>
    %22 = arith.shrui %20, %21 : vector<1x2x128xi32>
    %23 = arith.xori %20, %22 : vector<1x2x128xi32>
    %c-2073254261_i32 = arith.constant -2073254261 : i32
    %24 = vector.broadcast %c-2073254261_i32 : i32 to vector<1x2x128xi32>
    %25 = arith.muli %23, %24 : vector<1x2x128xi32>
    %c16_i32_7 = arith.constant 16 : i32
    %26 = vector.broadcast %c16_i32_7 : i32 to vector<1x2x128xi32>
    %27 = arith.shrui %25, %26 : vector<1x2x128xi32>
    %28 = arith.xori %25, %27 : vector<1x2x128xi32>
    %c429496730_i32 = arith.constant 429496730 : i32
    %29 = vector.broadcast %c429496730_i32 : i32 to vector<1x2x128xi32>
    %30 = arith.cmpi uge, %28, %29 : vector<1x2x128xi32>
    %cst = arith.constant 1.11111116 : f32
    %31 = vector.broadcast %cst : f32 to vector<1x2x128xf32>
    %32 = arith.mulf %2, %31 : vector<1x2x128xf32>
    %cst_8 = arith.constant 0.000000e+00 : f32
    %33 = vector.broadcast %cst_8 : f32 to vector<1x2x128xf32>
    %34 = arith.select %30, %32, %33 : vector<1x2x128xi1>, vector<1x2x128xf32>
    %c0_9 = arith.constant 0 : index
    %c0_10 = arith.constant 0 : index
    %c0_11 = arith.constant 0 : index
    %35 = vector.load %arg5[%c0_9, %c0_10, %c0_11] : memref<1x2x128xf32, #tpu.memory_space<vmem>>, vector<1x2x128xf32>
    tpu.vector_store %arg5[%c0_9, %c0_10, %c0_11], %34 {strides = array<i32>} : memref<1x2x128xf32, #tpu.memory_space<vmem>>, vector<1x2x128xf32>,
    return
  }
  func.func @transform_0(%arg0: i32, %arg1: i32, %arg2: memref<1xi32, #tpu.memory_space<smem>>) -> (i32, i32, i32) {
    %c0_i32 = arith.constant 0 : i32
    %c0_i32_0 = arith.constant 0 : i32
    return %arg0, %arg1, %c0_i32 : i32, i32, i32
  }
  func.func @transform_1(%arg0: i32, %arg1: i32, %arg2: memref<1xi32, #tpu.memory_space<smem>>) -> (i32, i32, i32) {
    %c0_i32 = arith.constant 0 : i32
    %c0_i32_0 = arith.constant 0 : i32
    %c0_i32_1 = arith.constant 0 : i32
    return %c0_i32, %arg1, %c0_i32_0 : i32, i32, i32
  }
  func.func @transform_2(%arg0: i32, %arg1: i32, %arg2: memref<1xi32, #tpu.memory_space<smem>>) -> (i32, i32, i32) {
    %c0_i32 = arith.constant 0 : i32
    %c0_i32_0 = arith.constant 0 : i32
    return %arg0, %arg1, %c0_i32 : i32, i32, i32
  }
}

</mosaic_0001>

<bundles_post_ra>
// kernel: tpu_custom_call.1
= control target key start
LH: loop header
LB: loop body
LE: loop exit
PB: predicated region body
PF: predicated region fallthrough
CT: control target
= control target key end

     0   :  { %s726_s0 = inlined_call_operand.<no memory space> [shape: s32[1], index: 0, kind: input, shape index: {}]   ;;  %s727_s1 = inlined_call_operand.hbm [shape: f32[2,2,128], index: 1, kind: input, shape index: {}]   ;;  %s728_s2 = inlined_call_operand.vmem [shape: f32[1,2,128], index: 2, kind: input, shape index: {}]   ;;  %s729_s3 = inlined_call_operand.hbm [shape: f32[2,2,128], index: 3, kind: output, shape index: {}]  }
   0x1   :  { %8 = sst [smem:[#allocation3]] %s726_s0 }
   0x2   :  { %9 = vsyncpa [#allocation5], 0 }
   0x3   :  { %11 = vsyncpa [#allocation5 + $0x1], 0 }
   0x4   :  { %12 = vsyncpa [#allocation6], 0 }
   0x5   :  { %14 = vsyncpa [#allocation6 + $0x1], 0  ;;  %s550_s14 = smov 0   ;;  %s552_s15 = smov 0  }
   0x6   :  { %s554_s16 = smov 0   ;;  %s556_s17 = smov 0  }
   0x7   :  { %s558_s18 = smov 0   ;;  %s560_s19 = smov 0  }
   0x8 LB: > { %s334_s0 = sadd.s32 4294967295, %s523_s19   ;;  %s335_s20 = sadd.s32 4294967294, %s523_s19   ;;  %s523_s19 = sphi %s560_s19, %s20_s19   ;;  %s519_s18 = sphi %s558_s18, %s745_s18   ;;  %s515_s17 = sphi %s556_s17, %s744_s17   ;;  %s511_s16 = sphi %s554_s16, %s743_s16   ;;  %s507_s15 = sphi %s552_s15, %s742_s15   ;;  %s503_s14 = sphi %s550_s14, %s741_s14  }
   0x9   : > { %s32_s21 = sadd.s32 1, %s519_s18  ;;  %s41_s22 = sadd.s32 1, %s511_s16 }
   0xa   : > { %p34_p0 = scmp.ge.s32.totalorder %s32_s21, 2  ;;  %p48_p1 = scmp.ne.s32.totalorder %s511_s16, %s507_s15 }
   0xb   : > { %p49_p2 = scmp.eq.s32.totalorder %s523_s19, 0  ;;  %p54_p3 = scmp.ne.s32.totalorder %s507_s15, %s503_s14 }
   0xc   : > { %s747_s21 = smov (%p34_p0, %s32_s21), 0  ;;  %p55_p5 = scmp.eq.s32.totalorder %s334_s0, 0 }
   0xd   : > { %p591_p4 = por %p49_p2, %p48_p1  ;;  %s36_s24 = ssub.s32 %s519_s18, %s747_s21 }
   0xe   : > { %p106_p6 = scmp.eq.s32.totalorder %s334_s0, 1  ;;  %p39_p7 = scmp.eq.s32.totalorder %s36_s24, 0 }
   0xf   : > { %p597_p8 = por %p55_p5, %p54_p3  ;;  %p112_p10 = scmp.eq.s32.totalorder %s335_s20, 1 }
  0x10   : > { %p601_p9 = por %p106_p6, %p48_p1  ;;  %p361_p13 = scmp.lt.s32.totalorder %s523_s19, 2 }
  0x11   : > { %s606_s27 = scalar_select %p39_p7, %s511_s16, %s41_s22  }
  0x12   : > { %s733_s26 = scalar_select %p601_p9, 1, 0 }
  0x13   : > { %p608_p11 = por %p112_p10, %p54_p3  ;;  %s139_s29 = sand.u32 1, %s511_s16  }
  0x14   : > { %s339_s30 = sshll.u32 %s139_s29, 1  ;;  %s340_s4 = sshll.u32 %s519_s18, 5 }
  0x15   : > { %s734_s28 = scalar_select %p608_p11, 1, 0 }
  0x16   : > { %s619_s7 = scalar_lea.hbm %s727_s1, %s340_s4  ;;  %s143_s8 = scalar_lea.vmem [#allocation4], %s339_s30 }
  0x17   : > { %s151_s9 = sshll.u32 %s143_s8, 4  ;;  %p625_p0 = pnand %p361_p13, %p591_p4  ;;  %s621_s9 = int_to_ptr.vmem [resolvable:$true] %s151_s9 }
  0x18   : > { %s140_s11 = scalar_lea.sflag [#allocation5], %s139_s29  ;;  %s411_s12 = scalar_lea.hbm %s619_s7, 32 }
  0x19   : > { %p412_p3 = scmp.ne.s32.totalorder %s619_s7, %s411_s12  ;;  %p413_p5 = pneg %p625_p0 }
  0x1a   : > { %s416_s20 = scalar_lea.hbm %s727_s1, 64  ;;  %p417_p4 = scmp.lt.u32.totalorder %s619_s7, %s727_s1 }
  0x1b   : > { %p414_p6 = pnand %p413_p5, %p412_p3  ;;  %p418_p10 = scmp.lt.u32.totalorder %s416_s20, %s411_s12 }
  0x1c   : > { %p420_p12 = scmp.lt.u32.totalorder %s411_s12, %s619_s7 }
  0x1d   : > { %p415_p7 = pneg %p414_p6  ;;  %p419_p13 = por %p418_p10, %p417_p4 }
  0x1f   : > { %p421_p1 = por %p420_p12, %p419_p13 }
  0x21   : > { %p422_p2 = pnand %p421_p1, %p415_p7 }
  0x23   : > { %425 = shalt.err (!%p422_p2)
}
  0x24   : > { %s426_s24 = scalar_lea.vmem %s621_s9, 32  ;;  %s525_s29 = smov [#allocation4]  }
  0x25   : > { %p427_p3 = scmp.ne.s32.totalorder %s621_s9, %s426_s24  ;;  %s431_s30 = sshll.u32 %s525_s29, 4  ;;  %s432_s30 = int_to_ptr.vmem [resolvable:$false] %s431_s30 }
  0x26   : > { %s433_s4 = scalar_lea.vmem %s432_s30, 64  ;;  %p434_p9 = scmp.lt.s32.totalorder %s621_s9, %s432_s30 }
  0x27   : > { %p429_p6 = pnand %p427_p3, %p413_p5  ;;  %p435_p4 = scmp.lt.s32.totalorder %s433_s4, %s426_s24 }
  0x29   : > { %p430_p11 = pneg %p429_p6  ;;  %p436_p10 = por %p435_p4, %p434_p9 }
  0x2b   : > { %p437_p12 = pnand %p436_p10, %p430_p11 }
  0x2d   : > { %440 = shalt.err (!%p437_p12)
}
  0x2e   : > { %356 = dma.hbm_to_vmem [thread:$0]  (!%p625_p0), %s619_s7, 32, %s621_s9, %s140_s11  }
  0x2f   : > { %p736_p1 = scmp.lt.s32.totalorder %s523_s19, 3  ;;  %p737_p2 = scmp.ge.s32.totalorder %s523_s19, 1 }
  0x31   : > { %p157_p5 = pnand %p737_p2, %p736_p1 }
  0x32   : > { %s661_s5 = sand.u32 (!%p157_p5), 1, %s507_s15  }
  0x33   : > { %160 = sbr.rel (%p157_p5) target bundleno = 103 (0x67), region = 28  ;;  %s342_s6 = sshll.u32 (!%p157_p5), %s661_s5, 1 }
  0x34   : > { %s163_s8 = scalar_lea.sflag (!%p157_p5), [#allocation5], %s661_s5  ;;  %s166_s12 = scalar_lea.vmem (!%p157_p5), [#allocation4], %s342_s6 }
  0x3a   : > { %494 = dma.done.wait (%p597_p8), %s163_s8, 32  }
  0x3b   : > { %496 = vsyncadd (%p597_p8), %s163_s8, 4294967264  ;;  %v198_v0 = vlaneseq  ;;  %s344_s7 = sshll.u32 %s515_s17, 1  ;;  %s209_s9 = sld [smem:[#allocation3]]  ;;  %v195_v12 = vld [vmem:[%s166_s12] sm:$0x3] }
  0x3c   : > { %v205_v1 = vstv %s344_s7  ;;  %v196_v13 = vld [vmem:[%s728_s2] sm:$0x3]  ;;  %s190_s11 = scalar_lea.vmem [#allocation7], %s342_s6  ;;  %s346_s0 = sshll.u32 %s515_s17, 5 }
  0x3d   : > { %v199_v2 = vshrl.u32 %v198_v0, 7  ;;  %v201_v3 = vand.u32 127, %v198_v0  ;;  %v197_v16 = vadd.f32 %v196_v13, %v195_v12  ;;  %s239_s13 = sshll.u32 %s190_s11, 4  ;;  %s679_s23 = scalar_lea.hbm %s729_s3, %s346_s0  ;;  %s674_s13 = int_to_ptr.vmem [resolvable:$true] %s239_s13 }
  0x3e   : > { %s225_s24 = scalar_lea.sflag [#allocation6], %s661_s5  ;;  %s441_s29 = scalar_lea.vmem %s674_s13, 32 }
  0x3f   : > { %v206_v4 = vadd.s32 %v205_v1, %v199_v2  ;;  %v221_v19 = vmul.f32 1.1111112, %v197_v16  ;;  %p442_p8 = scmp.ne.s32.totalorder %s674_s13, %s441_s29  ;;  %p738_p9 = scmp.ne.s32.totalorder %s733_s26, 0 }
  0x40   : > { %s526_s17 = smov [#allocation7]  }
  0x41   : > { %v207_v5 = vmul.u32 128, %v206_v4  ;;  %v210_v6 = vstv %s209_s9  ;;  %p443_p11 = pnand %p442_p8, %p738_p9  ;;  %s445_s30 = sshll.u32 %s526_s17, 4  ;;  %s446_s30 = int_to_ptr.vmem [resolvable:$false] %s445_s30 }
  0x42   : > { %s447_s4 = scalar_lea.vmem %s446_s30, 64  ;;  %p448_p7 = scmp.lt.s32.totalorder %s674_s13, %s446_s30 }
  0x43   : > { %v208_v7 = vadd.s32 %v207_v5, %v201_v3  ;;  %p444_p0 = pneg %p443_p11  ;;  %p449_p13 = scmp.lt.s32.totalorder %s447_s4, %s441_s29 }
  0x45   : > { %v211_v8 = vxor.u32 %v210_v6, %v208_v7  ;;  %p450_p3 = por %p449_p13, %p448_p7 }
  0x47   : > { %v212_v9 = vshrl.u32 %v211_v8, 16  ;;  %p451_p6 = pnand %p450_p3, %p444_p0 }
  0x49   : > { %v213_v10 = vxor.u32 %v212_v9, %v211_v8 }
  0x4b   : > { %v214_v11 = vmul.u32 2146121005, %v213_v10 }
  0x4d   : > { %v215_v14 = vshrl.u32 %v214_v11, 15 }
  0x4f   : > { %v216_v15 = vxor.u32 %v215_v14, %v214_v11 }
  0x51   : > { %v217_v17 = vmul.u32 2221713035, %v216_v15 }
  0x53   : > { %v218_v18 = vshrl.u32 %v217_v17, 16 }
  0x55   : > { %v219_v20 = vxor.u32 %v218_v18, %v217_v17 }
  0x57   : > { %vm220_vm0 = vcmp.ge.u32.totalorder %v219_v20, 429496730 }
  0x58   : > { %v222_v21 = vsel %vm220_vm0, %v221_v19, 0.0 }
  0x59   : > { %223 = vst [vmem:[%s190_s11] sm:$0x3] %v222_v21 }
  0x5a   : > { %454 = shalt.err (!%p451_p6)
}
  0x5b   : > { %s455_s5 = scalar_lea.hbm %s679_s23, 32  ;;  %s459_s12 = scalar_lea.hbm %s729_s3, 64 }
  0x5c   : > { %p456_p4 = scmp.ne.s32.totalorder %s679_s23, %s455_s5  ;;  %p460_p1 = scmp.lt.u32.totalorder %s679_s23, %s729_s3 }
  0x5d   : > { %p461_p2 = scmp.lt.u32.totalorder %s459_s12, %s455_s5  ;;  %p463_p8 = scmp.lt.u32.totalorder %s455_s5, %s679_s23 }
  0x5e   : > { %p457_p10 = pnand %p456_p4, %p738_p9 }
  0x5f   : > { %p462_p5 = por %p461_p2, %p460_p1 }
  0x60   : > { %p458_p12 = pneg %p457_p10 }
  0x61   : > { %p464_p11 = por %p463_p8, %p462_p5 }
  0x63   : > { %p465_p0 = pnand %p464_p11, %p458_p12 }
  0x65   : > { %468 = shalt.err (!%p465_p0)
}
  0x66   : > { %351 = dma.vmem_to_hbm [thread:$0]  (%p738_p9), %s674_s13, 32, %s679_s23, %s225_s24  }
  0x67 PF: > { %s251_s10 = sand.u32 1, %s503_s14   ;;  %p739_p7 = scmp.ne.s32.totalorder %s734_s28, 0 }
  0x68   : > { %p740_p13 = scmp.ge.s32.totalorder %s523_s19, 2  ;;  %s252_s25 = scalar_lea.sflag [#allocation6], %s251_s10 }
  0x6a   : > { %p358_p3 = pnand %p740_p13, %p739_p7 }
  0x6c   : > { %498 = dma.done.wait (!%p358_p3), %s252_s25, 32  }
  0x6d   : > { %500 = vsyncadd (!%p358_p3), %s252_s25, 4294967264  ;;  %s20_s19 = sadd.s32 1, %s523_s19   ;;  %s741_s14 = smov %s507_s15 }
  0x6e   : > { %p17_p6 = scmp.ge.s32.totalorder %s20_s19, 4   ;;  %s742_s15 = smov %s511_s16 }
  0x6f   : > { %s743_s16 = smov %s606_s27  ;;  %s744_s17 = smov %s519_s18 }
  0x70   : > { %s745_s18 = smov %s747_s21  ;;  %19 = sbr.rel (!%p17_p6) target bundleno = 8 (0x8), region = 76 }
  0x77   :  { %257 = vsyncpa [#allocation5], 1 }
  0x78   :  { %259 = vsyncpa [#allocation5 + $0x1], 1 }
  0x79   :  { %260 = vsyncpa [#allocation6], 1 }
  0x7a   :  { %262 = vsyncpa [#allocation6 + $0x1], 1 }

</bundles_post_ra>
